<compile_context>
chip_gen: v7x
topology: tpu7x:2x2x1
jax: 0.10.0
libtpu: 0.0.40
codegen_flags: <defaults>
</compile_context>

<pallas_src>
import jax
import jax.numpy as jnp
from jax.experimental import pallas as pl
from jax.experimental.pallas import tpu as pltpu

_LANE = 128
_SUBLANE = 8


def _preproc_fundiv_kernel(b_ref, c_ref, d_ref, x_ref, o_ref):
    # b_ref: (1,)    f32 SMEM -> alpha * rggb_max
    # c_ref: (BR,1)  f32 VMEM -> (1 + alpha - mean_row) / std_row
    # d_ref: (BR,1)  f32 VMEM -> (1 + alpha) * alpha * rggb_max / std_row
    # x_ref / o_ref: (BR,BC) f32 VMEM
    x = x_ref[...]
    # Exact division (not approx=True reciprocal) so the refactored formula
    # stays within ~1e-5 of the original x/M -> tone-curve -> normalize chain.
    o_ref[...] = c_ref[...] - d_ref[...] / (x + b_ref[0])


def _vmem_capacity_bytes():
    try:
        return int(pltpu.get_tpu_info().vmem_capacity_bytes)
    except Exception:
        return 64 * 1024 * 1024          # conservative fallback: v7x per-TC VMEM


def _choose_blocks(R, L, target_elems):
    """(8,128)-legal block shape with BR*BC <= target_elems (unless even a
    minimal (<=8, <=128-or-L) block exceeds it)."""
    br_min = min(R, _SUBLANE)

    # Lane (last) dim: whole row(s) if they fit the budget, otherwise the
    # largest 128-multiple that does (ragged tail blocks are masked by Pallas).
    # TODO(synk): when H*W % 128 != 0 the tail vregs use masked stores; padding
    # the lane dim would add a full extra HBM copy on a bandwidth-bound op, so
    # we accept the masked tail instead.
    if L * br_min <= target_elems:
        BC = L
    else:
        BC = max(_LANE, ((target_elems // br_min) // _LANE) * _LANE)
        if BC >= L:
            BC = L

    # Row (sublane) dim: as many rows as the budget allows, multiple of 8
    # (or the full extent R).
    rows = max(1, target_elems // BC)
    if rows >= R:
        BR = R
    else:
        BR = min(R, max(_SUBLANE, (rows // _SUBLANE) * _SUBLANE))

    # v7x has 2 TensorCores: guarantee >=2 parallel grid steps when splittable.
    if pl.cdiv(R, BR) * pl.cdiv(L, BC) == 1:
        if R >= 2 * _SUBLANE:
            BR = max(_SUBLANE, ((R // 2) // _SUBLANE) * _SUBLANE)
        elif L >= 2 * _LANE:
            BC = max(_LANE, ((L // 2) // _LANE) * _LANE)
    return BR, BC


def preproc_model_norm_fundiv(x, rggb_max, mean, std, alpha,
                              *, target_tile_bytes=4 * 1024 * 1024):
    """x: (N, C, H, W) float32; mean/std: (C,); rggb_max/alpha scalars."""
    N, C, H, W = x.shape
    R, L = N * C, H * W
    # Lane-dense 2-D view: each row is one (n, c) image plane, so the
    # per-channel constants become per-row columns (free lane broadcast).
    x2 = x.reshape(R, L)

    mean = jnp.asarray(mean, jnp.float32).reshape(C)
    std = jnp.asarray(std, jnp.float32).reshape(C)
    rggb_max = jnp.asarray(rggb_max, jnp.float32)
    alpha = jnp.asarray(alpha, jnp.float32)

    # out = c_row - d_row / (x + b)   (all constant divides folded here)
    b = (alpha * rggb_max).reshape(1)                                   # (1,)
    c_col = jnp.tile((1.0 + alpha - mean) / std, N).reshape(R, 1)       # row r -> channel r % C
    d_col = jnp.tile((1.0 + alpha) * alpha * rggb_max / std, N).reshape(R, 1)

    # Generation-aware tile budget: keep double-buffered in+out tiles well
    # under the smallest target's VMEM (v7x: 64 MiB physical / 32 MiB scoped).
    vmem_cap = _vmem_capacity_bytes()
    tile_budget_bytes = min(int(target_tile_bytes), vmem_cap // 16)
    target_elems = max(_SUBLANE * _LANE, tile_budget_bytes // 4)

    BR, BC = _choose_blocks(R, L, target_elems)
    grid = (pl.cdiv(R, BR), pl.cdiv(L, BC))

    # VMEM limit derived from the actual blocks: x + out tiles double-buffered,
    # two (BR,1) columns (lane-padded to 128) double-buffered, + compiler slack.
    block_bytes = BR * BC * 4
    col_bytes = BR * _LANE * 4
    vmem_limit = 4 * block_bytes + 4 * col_bytes + (2 << 20)
    vmem_limit = int(min(max(vmem_limit, 16 << 20), vmem_cap))
    assert 4 * block_bytes < vmem_limit

    out2 = pl.pallas_call(
        _preproc_fundiv_kernel,
        out_shape=jax.ShapeDtypeStruct((R, L), jnp.float32),
        grid_spec=pltpu.PrefetchScalarGridSpec(
            num_scalar_prefetch=0,
            grid=grid,
            in_specs=[
                pl.BlockSpec(memory_space=pltpu.MemorySpace.SMEM),   # b scalar
                pl.BlockSpec((BR, 1), lambda i, j: (i, 0)),          # c column
                pl.BlockSpec((BR, 1), lambda i, j: (i, 0)),          # d column
                pl.BlockSpec((BR, BC), lambda i, j: (i, j)),         # x tile
            ],
            out_specs=pl.BlockSpec((BR, BC), lambda i, j: (i, j)),
        ),
        compiler_params=pltpu.CompilerParams(
            dimension_semantics=("parallel", "parallel"),
            vmem_limit_bytes=vmem_limit,
        ),
    )(b, c_col, d_col, x2)

    return out2.reshape(N, C, H, W)


if __name__ == "__main__":
    key = jax.random.PRNGKey(0)

    # Deterministic synthetic "preproc_params" (RGGB raw-like)
    N, C, H, W = 2, 4, 16, 16
    rggb_max = 1023.0                       # 10-bit raw max
    mean = jnp.array([0.485, 0.456, 0.406, 0.450], dtype=jnp.float32)
    std = jnp.array([0.229, 0.224, 0.225, 0.230], dtype=jnp.float32)
    alpha = 0.5                             # preproc_params['value']

    x = jax.random.uniform(key, (N, C, H, W), jnp.float32,
                           minval=0.0, maxval=rggb_max)

    out = preproc_model_norm_fundiv(x, rggb_max, mean, std, alpha)
    out = jax.block_until_ready(out)

    # Pure-JAX reference mirroring the PyTorch forward exactly
    y = x / rggb_max
    y = y * (1.0 + alpha) / (y + alpha)
    ref = (y - mean.reshape(1, C, 1, 1)) / std.reshape(1, C, 1, 1)
    max_err = float(jnp.max(jnp.abs(out - ref)))
    assert jnp.allclose(out, ref, atol=2e-5, rtol=2e-5), max_err

    print("KERNEL_OK")
</pallas_src>

<mosaic_0001>
module attributes {stable_mosaic.version = 11 : i64} {
  func.func @_preproc_fundiv_kernel(%arg0: i32, %arg1: i32, %arg2: memref<1xf32, #tpu.memory_space<smem>>, %arg3: memref<8x1xf32, #tpu.memory_space<vmem>>, %arg4: memref<8x1xf32, #tpu.memory_space<vmem>>, %arg5: memref<8x128xf32, #tpu.memory_space<vmem>>, %arg6: memref<8x128xf32, #tpu.memory_space<vmem>>) attributes {dimension_semantics = [#tpu.dimension_semantics<parallel>, #tpu.dimension_semantics<parallel>], iteration_bounds = array<i64: 1, 2>, scalar_prefetch = 0 : i64, scratch_operands = 0 : i64, tpu.core_type = #tpu.core_type<tc>, window_params = [{transform_indices = @transform_0, window_bounds = array<i64: 1>}, {transform_indices = @transform_1, window_bounds = array<i64: 8, 1>}, {transform_indices = @transform_2, window_bounds = array<i64: 8, 1>}, {transform_indices = @transform_3, window_bounds = array<i64: 8, 128>}, {transform_indices = @transform_4, window_bounds = array<i64: 8, 128>}]} {
    %c0 = arith.constant 0 : index
    %c0_0 = arith.constant 0 : index
    %0 = vector.load %arg5[%c0, %c0_0] : memref<8x128xf32, #tpu.memory_space<vmem>>, vector<8x128xf32>
    %c0_1 = arith.constant 0 : index
    %c0_2 = arith.constant 0 : index
    %1 = vector.load %arg3[%c0_1, %c0_2] : memref<8x1xf32, #tpu.memory_space<vmem>>, vector<8x1xf32>
    %c0_3 = arith.constant 0 : index
    %c0_4 = arith.constant 0 : index
    %2 = vector.load %arg4[%c0_3, %c0_4] : memref<8x1xf32, #tpu.memory_space<vmem>>, vector<8x1xf32>
    %c0_5 = arith.constant 0 : index
    %3 = memref.load %arg2[%c0_5] : memref<1xf32, #tpu.memory_space<smem>>
    %4 = vector.broadcast %3 : f32 to vector<8x128xf32>
    %5 = arith.addf %0, %4 : vector<8x128xf32>
    %6 = vector.broadcast %2 : vector<8x1xf32> to vector<8x128xf32>
    %7 = arith.divf %6, %5 : vector<8x128xf32>
    %8 = vector.broadcast %1 : vector<8x1xf32> to vector<8x128xf32>
    %9 = arith.subf %8, %7 : vector<8x128xf32>
    %c0_6 = arith.constant 0 : index
    %c0_7 = arith.constant 0 : index
    %10 = vector.load %arg6[%c0_6, %c0_7] : memref<8x128xf32, #tpu.memory_space<vmem>>, vector<8x128xf32>
    tpu.vector_store %arg6[%c0_6, %c0_7], %9 {strides = array<i32>} : memref<8x128xf32, #tpu.memory_space<vmem>>, vector<8x128xf32>,
    return
  }
  func.func @transform_0(%arg0: i32, %arg1: i32) -> i32 {
    %c0_i32 = arith.constant 0 : i32
    %c0_i32_0 = arith.constant 0 : i32
    return %c0_i32 : i32
  }
  func.func @transform_1(%arg0: i32, %arg1: i32) -> (i32, i32) {
    %c0_i32 = arith.constant 0 : i32
    %c0_i32_0 = arith.constant 0 : i32
    return %arg0, %c0_i32 : i32, i32
  }
  func.func @transform_2(%arg0: i32, %arg1: i32) -> (i32, i32) {
    %c0_i32 = arith.constant 0 : i32
    %c0_i32_0 = arith.constant 0 : i32
    return %arg0, %c0_i32 : i32, i32
  }
  func.func @transform_3(%arg0: i32, %arg1: i32) -> (i32, i32) {
    %c0_i32 = arith.constant 0 : i32
    return %arg0, %arg1 : i32, i32
  }
  func.func @transform_4(%arg0: i32, %arg1: i32) -> (i32, i32) {
    %c0_i32 = arith.constant 0 : i32
    return %arg0, %arg1 : i32, i32
  }
}

</mosaic_0001>

<bundles_post_ra>
// kernel: tpu_custom_call.1
= control target key start
LH: loop header
LB: loop body
LE: loop exit
PB: predicated region body
PF: predicated region fallthrough
CT: control target
= control target key end

     0   :  { %s697_s0 = inlined_call_operand.<no memory space> [shape: f32[1], index: 0, kind: input, shape index: {}]   ;;  %s698_s1 = inlined_call_operand.vmem [shape: f32[8,1], index: 1, kind: input, shape index: {}]   ;;  %s699_s2 = inlined_call_operand.vmem [shape: f32[8,1], index: 2, kind: input, shape index: {}]   ;;  %s700_s3 = inlined_call_operand.vmem [shape: f32[8,256], index: 3, kind: input, shape index: {}]   ;;  %s701_s4 = inlined_call_operand.hbm [shape: f32[8,256], index: 4, kind: output, shape index: {}]  }
   0x1   :  { %9 = sst [smem:[#allocation2]] %s697_s0 }
   0x2   :  { %10 = vsyncpa [#allocation4], 0 }
   0x3   :  { %12 = vsyncpa [#allocation4 + $0x1], 0  ;;  %s579_s17 = smov 0   ;;  %s581_s18 = smov 0  }
   0x4   :  { %s583_s19 = smov 0   ;;  %s585_s20 = smov 0  }
   0x5   :  { %s587_s21 = smov 0   ;;  %s589_s22 = smov 0  }
   0x6 LB: > { %s397_s0 = sadd.s32 4294967295, %s547_s22   ;;  %s398_s23 = sadd.s32 4294967294, %s547_s22   ;;  %s547_s22 = sphi %s589_s22, %s18_s22   ;;  %s543_s21 = sphi %s587_s21, %s708_s21   ;;  %s539_s20 = sphi %s585_s20, %s707_s20   ;;  %s535_s19 = sphi %s583_s19, %s706_s19   ;;  %s531_s18 = sphi %s581_s18, %s705_s18   ;;  %s527_s17 = sphi %s579_s17, %s704_s17  }
   0x7   : > { %s27_s24 = sadd.s32 1, %s543_s21  ;;  %s140_s25 = sadd.s32 1, %s535_s19 }
   0x8   : > { %p28_p0 = scmp.ge.s32.totalorder %s27_s24, 2  ;;  %p150_p1 = scmp.ne.s32.totalorder %s535_s19, %s531_s18 }
   0x9   : > { %p151_p2 = scmp.eq.s32.totalorder %s397_s0, 1  ;;  %p156_p3 = scmp.ne.s32.totalorder %s531_s18, %s527_s17 }
   0xa   : > { %s710_s24 = smov (%p28_p0, %s27_s24), 0  ;;  %p157_p5 = scmp.eq.s32.totalorder %s398_s23, 1 }
   0xb   : > { %p619_p4 = por %p151_p2, %p150_p1  ;;  %s136_s27 = ssub.s32 %s543_s21, %s710_s24 }
   0xc   : > { %p403_p6 = scmp.ge.s32.totalorder %s547_s22, 1  ;;  %p138_p7 = scmp.eq.s32.totalorder %s136_s27, 0 }
   0xd   : > { %p626_p8 = por %p157_p5, %p156_p3  ;;  %p203_p9 = scmp.lt.s32.totalorder %s547_s22, 3 }
   0xe   : > { %s632_s29 = scalar_select %p138_p7, %s535_s19, %s140_s25  }
   0xf   : > { %p204_p10 = pnand %p403_p6, %p203_p9 }
  0x10   : > { %v258_v0 = vld [vmem:[%s699_s2] sm:$0xff] (!%p204_p10)  ;;  %v549_v1 = vmov (!%p204_p10), 0   ;;  %p250_p11 = scmp.lt.s32.totalorder (!%p204_p10), %s539_s20, 1  ;;  %s259_s9 = sld [smem:[#allocation2]] (!%p204_p10) }
  0x11   : > { %207 = sbr.rel (%p204_p10) target bundleno = 166 (0xa6), region = 36  ;;  %466 = vset.pattern.permute.xlu0 (!%p204_p10), %v549_v1  ;;  %v257_v2 = vld [vmem:[%s698_s1] sm:$0xff] (!%p204_p10)  ;;  %s237_s14 = sand.u32 (!%p204_p10), 1, %s531_s18  }
  0x12   : > { %264 = vperm.xlu0 (!%p204_p10), %466, %v258_v0   ;;  %s404_s15 = sshll.u32 (!%p204_p10), %s237_s14, 3  ;;  %s407_s16 = sshll.u32 (!%p204_p10), %s539_s20, 7 }
  0x13   : > { %s239_s0 = scalar_lea.vmem (!%p204_p10), [#allocation3], %s404_s15  ;;  %s650_s30 = scalar_lea.hbm (!%p204_p10), %s701_s4, %s407_s16 }
  0x14   : > { %s292_s23 = sshll.u32 (!%p204_p10), %s239_s0, 4  ;;  %s277_s5 = scalar_lea.sflag (!%p204_p10), [#allocation4], %s237_s14  ;;  %s652_s23 = int_to_ptr.vmem [resolvable:$true] %s292_s23 }
  0x15   : > { %s469_s6 = scalar_lea.vmem (!%p204_p10), %s652_s23, 128 }
  0x16   : > { %271 = vperm.xlu0 (!%p204_p10), %466, %v257_v2   ;;  %v260_v3 = vstv (!%p204_p10), %s259_s9  ;;  %p470_p12 = scmp.ne.s32.totalorder (!%p204_p10), %s652_s23, %s469_s6 }
  0x18   : > { %s251_s8 = scalar_select %p250_p11, %s539_s20, 1 }
  0x19   : > { %p471_p13 = pnand %p470_p12, %p619_p4  ;;  %s550_s20 = smov [#allocation3]  }
  0x1a   : > { %s405_s10 = sshll.u32 %s251_s8, 3  ;;  %s473_s7 = sshll.u32 %s550_s20, 4  ;;  %s474_s7 = int_to_ptr.vmem [resolvable:$false] %s473_s7 }
  0x1b   : > { %s255_s13 = scalar_lea.vmem %s700_s3, %s405_s10  ;;  %p472_p0 = pneg %p471_p13 }
  0x1c   : > { %v256_v4 = vld [vmem:[%s255_s13] sm:$0xff]  ;;  %s475_s8 = scalar_lea.vmem %s474_s7, 256  ;;  %p476_p1 = scmp.lt.s32.totalorder %s652_s23, %s474_s7 }
  0x1d   : > { %v261_v5 = vadd.f32 %v260_v3, %v256_v4  ;;  %p477_p2 = scmp.lt.s32.totalorder %s475_s8, %s469_s6 }
  0x1f   : > { %467 = vrcp.f32 %v261_v5  ;;  %p478_p3 = por %p477_p2, %p476_p1 }
  0x21   : > { %p479_p5 = pnand %p478_p3, %p472_p0 }
  0x29   : > { %v468_v6 = vpop.eup %467 }
  0x91   : > { %v265_v7 = vpop.permute.xlu0 %264 }
  0x92   : > { %v268_v8 = vmul.f32 %v468_v6, %v265_v7 }
  0x95   : > { %v272_v9 = vpop.permute.xlu0 %271 }
  0x96   : > { %v274_v10 = vsub.f32 %v272_v9, %v268_v8 }
  0x98   : > { %275 = vst [vmem:[%s239_s0] sm:$0xff] %v274_v10 }
  0x99   : > { %482 = shalt.err (!%p479_p5)
}
  0x9a   : > { %s483_s9 = scalar_lea.hbm %s650_s30, 128  ;;  %s487_s12 = scalar_lea.hbm %s701_s4, 256 }
  0x9b   : > { %p484_p6 = scmp.ne.s32.totalorder %s650_s30, %s483_s9  ;;  %p488_p10 = scmp.lt.u32.totalorder %s650_s30, %s701_s4 }
  0x9c   : > { %p489_p11 = scmp.lt.u32.totalorder %s487_s12, %s483_s9  ;;  %p491_p13 = scmp.lt.u32.totalorder %s483_s9, %s650_s30 }
  0x9d   : > { %p485_p7 = pnand %p484_p6, %p619_p4 }
  0x9e   : > { %p490_p12 = por %p489_p11, %p488_p10 }
  0x9f   : > { %p486_p9 = pneg %p485_p7 }
  0xa0   : > { %p492_p0 = por %p491_p13, %p490_p12 }
  0xa2   : > { %p493_p1 = pnand %p492_p0, %p486_p9 }
  0xa4   : > { %496 = shalt.err (!%p493_p1)
}
  0xa5   : > { %410 = dma.vmem_to_hbm [thread:$0]  (%p619_p4), %s652_s23, 128, %s650_s30, %s277_s5  }
  0xa6 PF: > { %p416_p2 = scmp.ge.s32.totalorder %s547_s22, 2  ;;  %s304_s15 = sand.u32 1, %s527_s17  }
  0xa7   : > { %s305_s16 = scalar_lea.sflag [#allocation4], %s304_s15 }
  0xa8   : > { %p413_p3 = pnand %p416_p2, %p626_p8 }
  0xaa   : > { %522 = dma.done.wait (!%p413_p3), %s305_s16, 128  }
  0xab   : > { %524 = vsyncadd (!%p413_p3), %s305_s16, 4294967168  ;;  %s18_s22 = sadd.s32 1, %s547_s22   ;;  %s704_s17 = smov %s531_s18 }
  0xac   : > { %p15_p5 = scmp.ge.s32.totalorder %s18_s22, 4   ;;  %s705_s18 = smov %s535_s19 }
  0xad   : > { %s706_s19 = smov %s632_s29  ;;  %s707_s20 = smov %s543_s21 }
  0xae   : > { %s708_s21 = smov %s710_s24  ;;  %17 = sbr.rel (!%p15_p5) target bundleno = 6 (0x6), region = 77 }
  0xb5   :  { %310 = vsyncpa [#allocation4], 1 }
  0xb6   :  { %312 = vsyncpa [#allocation4 + $0x1], 1 }

</bundles_post_ra>
